<compile_context>
chip_gen: v7x
topology: tpu7x:2x2x1
jax: 0.10.0
libtpu: 0.0.40
codegen_flags: <defaults>
</compile_context>

<pallas_src>
import jax
import jax.numpy as jnp
from jax.experimental import pallas as pl
from jax.experimental.pallas import tpu as pltpu

# Below this many output bytes, XLA's native concat beats the fixed
# pallas_call + DMA-issue overhead on every TPU generation.
_SMALL_INPUT_BYTES = 256 * 1024

# Target bytes per DMA chunk (amortizes descriptor/setup cost) and the max
# number of concurrently issued row chunks (DMA-engine parallelism).
_DMA_CHUNK_TARGET_BYTES = 4 * 1024 * 1024
_MAX_DMA_CHUNKS = 8


def _num_dma_chunks(n, out_bytes):
    want = -(-out_bytes // _DMA_CHUNK_TARGET_BYTES)  # ceil
    return int(max(1, min(_MAX_DMA_CHUNKS, n, want)))


def _row_bounds(n, nchunks):
    """Static row-chunk boundaries; every chunk but possibly the last has a
    size that is a multiple of 8 (sublane), so DMAs start sublane-aligned."""
    per = max(8, -(-n // nchunks))      # ceil(n / nchunks)
    per = -(-per // 8) * 8              # round up to multiple of 8
    bounds = list(range(0, n, per))
    bounds.append(n)
    return bounds


def _make_merge_dma_kernel(d1, d2, row_bounds):
    """Gridless kernel: copy x1 -> out[:, :d1] and x2 -> out[:, d1:] with
    direct HBM->HBM strided DMAs (no VMEM staging, no TC vector work)."""
    chunks = [(lo, hi - lo)
              for lo, hi in zip(row_bounds[:-1], row_bounds[1:]) if hi > lo]
    num_sems = 2 * len(chunks)

    def kernel(x1_hbm, x2_hbm, o_hbm, sems):
        copies = []
        s = 0
        for lo, sz in chunks:           # static Python loop, unrolled at trace
            rows = pl.ds(lo, sz)
            copies.append(pltpu.make_async_copy(
                x1_hbm.at[rows, :], o_hbm.at[rows, pl.ds(0, d1)], sems.at[s]))
            s += 1
            copies.append(pltpu.make_async_copy(
                x2_hbm.at[rows, :], o_hbm.at[rows, pl.ds(d1, d2)], sems.at[s]))
            s += 1
        # Start every DMA first (concurrent streams), then wait for all.
        for c in copies:
            c.start()
        for c in copies:
            c.wait()

    return kernel, num_sems


def merge(x1, x2, *, use_pallas=None):
    """x1: (N, ...), x2: (N, ...) -> (N, D1 + D2); matches torch.cat(flatten).

    use_pallas: None  -> auto (Pallas DMA kernel only when it pays off),
                True  -> force the Pallas kernel (if the shapes allow it),
                False -> plain XLA concat.
    """
    n = x1.shape[0]
    assert x2.shape[0] == n, "batch dims must match"

    # Flatten: free view for row-major-contiguous inputs (done outside kernel).
    x1f = x1.reshape(n, -1)
    x2f = x2.reshape(n, -1)
    if x1f.dtype != x2f.dtype:
        dt = jnp.promote_types(x1f.dtype, x2f.dtype)
        x1f, x2f = x1f.astype(dt), x2f.astype(dt)
    dtype = x1f.dtype
    d1, d2 = x1f.shape[1], x2f.shape[1]
    d_out = d1 + d2
    itemsize = jnp.dtype(dtype).itemsize
    out_bytes = n * d_out * itemsize

    if use_pallas is None:
        use_pallas = out_bytes >= _SMALL_INPUT_BYTES

    # Fast / fallback path: tiny inputs, degenerate shapes, or a lane-unaligned
    # interior offset (d1 % 128 != 0) where the second DMA's destination would
    # start mid-tile.  XLA's concat is correct and fast for all of these.
    if (not use_pallas) or n == 0 or d1 == 0 or d2 == 0 or (d1 % 128 != 0):
        return jnp.concatenate([x1f, x2f], axis=1)

    nchunks = _num_dma_chunks(n, out_bytes)
    bounds = _row_bounds(n, nchunks)
    kernel, num_sems = _make_merge_dma_kernel(d1, d2, bounds)

    return pl.pallas_call(
        kernel,
        out_shape=jax.ShapeDtypeStruct((n, d_out), dtype),
        in_specs=[
            pl.BlockSpec(memory_space=pl.ANY),   # x1 stays in HBM
            pl.BlockSpec(memory_space=pl.ANY),   # x2 stays in HBM
        ],
        out_specs=pl.BlockSpec(memory_space=pl.ANY),  # out written via DMA
        scratch_shapes=[pltpu.SemaphoreType.DMA((num_sems,))],
        cost_estimate=pl.CostEstimate(
            flops=0, transcendentals=0, bytes_accessed=int(2 * out_bytes)),
    )(x1f, x2f)


if __name__ == "__main__":
    # Shapes consistent with the DDH paper's merge of two conv branches:
    # batch=8, branch1 = (4, 16, 16) -> 1024 feats, branch2 = (2, 16, 16) -> 512.
    B = 8
    key = jax.random.PRNGKey(0)
    k1, k2 = jax.random.split(key)
    x1 = jax.random.normal(k1, (B, 4, 16, 16), dtype=jnp.float32)
    x2 = jax.random.normal(k2, (B, 2, 16, 16), dtype=jnp.float32)

    # Force the Pallas DMA kernel so it is exercised even at demo sizes.
    out = merge(x1, x2, use_pallas=True)
    out = jax.block_until_ready(out)

    # Pure-JAX reference for correctness.
    ref = jnp.concatenate([x1.reshape(B, -1), x2.reshape(B, -1)], axis=1)
    assert out.shape == (B, 4 * 16 * 16 + 2 * 16 * 16)
    assert jnp.array_equal(out, ref)

    # The auto (small-input fast) path must match too.
    out_auto = jax.block_until_ready(merge(x1, x2))
    assert jnp.array_equal(out_auto, ref)

    print("KERNEL_OK")
</pallas_src>

<mosaic_0001>
module attributes {stable_mosaic.version = 11 : i64} {
  func.func @kernel(%arg0: memref<8x1024xf32, #tpu.memory_space<any>>, %arg1: memref<8x512xf32, #tpu.memory_space<any>>, %arg2: memref<8x1536xf32, #tpu.memory_space<any>>, %arg3: memref<2x!tpu.dma_semaphore, #tpu.memory_space<semaphore_mem>>) attributes {dimension_semantics = [], scalar_prefetch = 0 : i64, scratch_operands = 1 : i64, tpu.core_type = #tpu.core_type<tc>} {
    %c0_i32 = arith.constant 0 : i32
    %c0_i32_0 = arith.constant 0 : i32
    %c0_i32_1 = arith.constant 0 : i32
    %0 = tpu.memref_slice %arg0[%c0_i32_0, %c0_i32_1] : memref<8x1024xf32, #tpu.memory_space<any>> -> memref<8x1024xf32, #tpu.memory_space<any>>
    %c0_i32_2 = arith.constant 0 : i32
    %c0_i32_3 = arith.constant 0 : i32
    %1 = tpu.memref_slice %arg2[%c0_i32_2, %c0_i32_3] : memref<8x1536xf32, #tpu.memory_space<any>> -> memref<8x1024xf32, #tpu.memory_space<any>>
    %2 = tpu.memref_slice %arg3[%c0_i32] : memref<2x!tpu.dma_semaphore, #tpu.memory_space<semaphore_mem>> -> memref<1x!tpu.dma_semaphore, #tpu.memory_space<semaphore_mem>>
    %3 = tpu.memref_squeeze %2 : memref<1x!tpu.dma_semaphore, #tpu.memory_space<semaphore_mem>> -> memref<!tpu.dma_semaphore, #tpu.memory_space<semaphore_mem>>
    tpu.enqueue_dma source(%0 : memref<8x1024xf32, #tpu.memory_space<any>>) target(%1 : memref<8x1024xf32, #tpu.memory_space<any>>) target_semaphore(%3 : memref<!tpu.dma_semaphore, #tpu.memory_space<semaphore_mem>>)
    %c1_i32 = arith.constant 1 : i32
    %c0_i32_4 = arith.constant 0 : i32
    %c0_i32_5 = arith.constant 0 : i32
    %4 = tpu.memref_slice %arg1[%c0_i32_4, %c0_i32_5] : memref<8x512xf32, #tpu.memory_space<any>> -> memref<8x512xf32, #tpu.memory_space<any>>
    %c0_i32_6 = arith.constant 0 : i32
    %c1024_i32 = arith.constant 1024 : i32
    %5 = tpu.memref_slice %arg2[%c0_i32_6, %c1024_i32] : memref<8x1536xf32, #tpu.memory_space<any>> -> memref<8x512xf32, #tpu.memory_space<any>>
    %6 = tpu.memref_slice %arg3[%c1_i32] : memref<2x!tpu.dma_semaphore, #tpu.memory_space<semaphore_mem>> -> memref<1x!tpu.dma_semaphore, #tpu.memory_space<semaphore_mem>>
    %7 = tpu.memref_squeeze %6 : memref<1x!tpu.dma_semaphore, #tpu.memory_space<semaphore_mem>> -> memref<!tpu.dma_semaphore, #tpu.memory_space<semaphore_mem>>
    tpu.enqueue_dma source(%4 : memref<8x512xf32, #tpu.memory_space<any>>) target(%5 : memref<8x512xf32, #tpu.memory_space<any>>) target_semaphore(%7 : memref<!tpu.dma_semaphore, #tpu.memory_space<semaphore_mem>>)
    %c0_i32_7 = arith.constant 0 : i32
    %c0_i32_8 = arith.constant 0 : i32
    %c0_i32_9 = arith.constant 0 : i32
    %8 = tpu.memref_slice %arg0[%c0_i32_8, %c0_i32_9] : memref<8x1024xf32, #tpu.memory_space<any>> -> memref<8x1024xf32, #tpu.memory_space<any>>
    %c0_i32_10 = arith.constant 0 : i32
    %c0_i32_11 = arith.constant 0 : i32
    %9 = tpu.memref_slice %arg2[%c0_i32_10, %c0_i32_11] : memref<8x1536xf32, #tpu.memory_space<any>> -> memref<8x1024xf32, #tpu.memory_space<any>>
    %10 = tpu.memref_slice %arg3[%c0_i32_7] : memref<2x!tpu.dma_semaphore, #tpu.memory_space<semaphore_mem>> -> memref<1x!tpu.dma_semaphore, #tpu.memory_space<semaphore_mem>>
    %11 = tpu.memref_squeeze %10 : memref<1x!tpu.dma_semaphore, #tpu.memory_space<semaphore_mem>> -> memref<!tpu.dma_semaphore, #tpu.memory_space<semaphore_mem>>
    tpu.wait_dma2 semaphore(%11 : memref<!tpu.dma_semaphore, #tpu.memory_space<semaphore_mem>>) src(%8 : memref<8x1024xf32, #tpu.memory_space<any>>) dst(%9 : memref<8x1024xf32, #tpu.memory_space<any>>)
    %c1_i32_12 = arith.constant 1 : i32
    %c0_i32_13 = arith.constant 0 : i32
    %c0_i32_14 = arith.constant 0 : i32
    %12 = tpu.memref_slice %arg1[%c0_i32_13, %c0_i32_14] : memref<8x512xf32, #tpu.memory_space<any>> -> memref<8x512xf32, #tpu.memory_space<any>>
    %c0_i32_15 = arith.constant 0 : i32
    %c1024_i32_16 = arith.constant 1024 : i32
    %13 = tpu.memref_slice %arg2[%c0_i32_15, %c1024_i32_16] : memref<8x1536xf32, #tpu.memory_space<any>> -> memref<8x512xf32, #tpu.memory_space<any>>
    %14 = tpu.memref_slice %arg3[%c1_i32_12] : memref<2x!tpu.dma_semaphore, #tpu.memory_space<semaphore_mem>> -> memref<1x!tpu.dma_semaphore, #tpu.memory_space<semaphore_mem>>
    %15 = tpu.memref_squeeze %14 : memref<1x!tpu.dma_semaphore, #tpu.memory_space<semaphore_mem>> -> memref<!tpu.dma_semaphore, #tpu.memory_space<semaphore_mem>>
    tpu.wait_dma2 semaphore(%15 : memref<!tpu.dma_semaphore, #tpu.memory_space<semaphore_mem>>) src(%12 : memref<8x512xf32, #tpu.memory_space<any>>) dst(%13 : memref<8x512xf32, #tpu.memory_space<any>>)
    return
  }
}

</mosaic_0001>

<bundles_post_ra>
// kernel: tpu_custom_call.1
= control target key start
LH: loop header
LB: loop body
LE: loop exit
PB: predicated region body
PF: predicated region fallthrough
CT: control target
= control target key end

     0   :  { %s66_s12 = smov [#allocation2]   ;;  %s67_s13 = smov [#allocation3]   ;;  %s98_s0 = inlined_call_operand.hbm [shape: f32[8,1024], index: 0, kind: input, shape index: {}]   ;;  %s99_s2 = inlined_call_operand.hbm [shape: f32[8,1536], index: 2, kind: output, shape index: {}]   ;;  %s100_s1 = inlined_call_operand.hbm [shape: f32[8,512], index: 1, kind: input, shape index: {}]  }
   0x1   :  { %s20_s11 = scalar_lea.hbm %s99_s2, 1024  ;;  %s68_s14 = smov 0  }
   0x2   :  { %19 = dma.general %s98_s0, 1024, %s99_s2, %s66_s12, %s67_s13, [#allocation4], %s68_s14, 0  }
   0x3   :  { %s69_s19 = smov [#allocation2 + $0x1]   ;;  %s70_s20 = smov [#allocation5]  }
   0x4   :  { %34 = dma.general %s100_s1, 512, %s20_s11, %s69_s19, %s70_s20, [#allocation6], %s68_s14, 0  }
   0x5   :  { %62 = dma.done.wait [#allocation2], 1024 }
   0x6   :  { %63 = vsyncadd [#allocation2], 4294966272 }
   0x7   :  { %64 = dma.done.wait [#allocation2 + $0x1], 512 }
   0x8   :  { %65 = vsyncadd [#allocation2 + $0x1], 4294966784 }
   0x9   :  { %42 = vsyncmov [#allocation2] }
   0xc   :  { %s43_s23 = vpop.sfrf %42 }
   0xd   :  { %p55_p0 = scmp.ne.s32.totalorder %s43_s23, 0 }
   0xf   :  { %47 = shalt.err (%p55_p0)  }
  0x10   :  { %49 = vsyncmov [#allocation2 + $0x1] }
  0x13   :  { %s50_s24 = vpop.sfrf %49 }
  0x14   :  { %p56_p1 = scmp.ne.s32.totalorder %s50_s24, 0 }
  0x16   :  { %54 = shalt.err (%p56_p1)  }

</bundles_post_ra>
